<compile_context>
chip_gen: v7x
topology: tpu7x:2x2x1
jax: 0.10.0
libtpu: 0.0.40
codegen_flags: <defaults>
</compile_context>

<pallas_src>
import jax
import jax.numpy as jnp
from jax.experimental import pallas as pl
from jax.experimental.pallas import tpu as pltpu

D_IN = 784      # 1*28*28 (nn.Flatten output width)
H = 64          # hidden width
OUT = 10        # logits
MAX_TB = 512    # max batch-tile rows


def _cdiv(a, b):
    return (a + b - 1) // b


def _round_up(n, m):
    return ((n + m - 1) // m) * m


def _choose_tb(B):
    """Batch tile: multiple of 8, <= MAX_TB, sized to minimize padding waste,
    and >= 2 grid steps for mid/large batches so v7x's 2nd TensorCore gets work."""
    n_tiles = _cdiv(B, MAX_TB)
    if B > 256:
        n_tiles = max(n_tiles, 2)
    return _round_up(_cdiv(B, n_tiles), 8)


def _mlp_kernel(x_ref,
                w1_ref, b1_ref,
                w2_ref, b2_ref,
                w3_ref, b3_ref,
                w4_ref, b4_ref,
                w5_ref, b5_ref,
                o_ref):
    # f32 x tile streamed from HBM; bf16 cast happens on-chip (hidden under the DMA),
    # every dot is a single-pass bf16 MXU op with f32 accumulation.
    x = x_ref[...].astype(jnp.bfloat16)

    h = jnp.dot(x, w1_ref[...], preferred_element_type=jnp.float32) + b1_ref[...]
    h = jnp.maximum(h, 0.0)

    h = jnp.dot(h.astype(jnp.bfloat16), w2_ref[...],
                preferred_element_type=jnp.float32) + b2_ref[...]
    h = jnp.maximum(h, 0.0)

    h = jnp.dot(h.astype(jnp.bfloat16), w3_ref[...],
                preferred_element_type=jnp.float32) + b3_ref[...]
    h = jnp.maximum(h, 0.0)

    h = jnp.dot(h.astype(jnp.bfloat16), w4_ref[...],
                preferred_element_type=jnp.float32) + b4_ref[...]
    h = jnp.maximum(h, 0.0)

    o_ref[...] = (jnp.dot(h.astype(jnp.bfloat16), w5_ref[...],
                          preferred_element_type=jnp.float32)
                  + b5_ref[...]).astype(o_ref.dtype)


@jax.jit
def mnist_forward(x, params):
    """x: (B, 1, 28, 28) float32 NCHW.  params: dict of (in,out) weights / (1,out) biases."""
    B = x.shape[0]
    TB = _choose_tb(B)
    n_tiles = _cdiv(B, TB)

    # nn.Flatten — metadata-only reshape; no pad, no cast, no extra HBM copy of x.
    x2d = x.reshape(B, D_IN)

    # Weights cast to bf16 once (tiny, ~110 KB total); biases stay f32.
    w = [params[f"w{i}"].astype(jnp.bfloat16) for i in range(1, 6)]
    operands = (
        x2d,
        w[0], params["b1"],
        w[1], params["b2"],
        w[2], params["b3"],
        w[3], params["b4"],
        w[4], params["b5"],
    )

    # x is streamed over the batch grid (auto double-buffered); weights/biases map to
    # block (0,0) every step -> VMEM-resident across the whole grid.
    in_specs = [
        pl.BlockSpec((TB, D_IN), lambda i: (i, 0)),   # x tile (last dim = full array)
        pl.BlockSpec((D_IN, H), lambda i: (0, 0)),    # w1
        pl.BlockSpec((1, H), lambda i: (0, 0)),       # b1
        pl.BlockSpec((H, H), lambda i: (0, 0)),       # w2
        pl.BlockSpec((1, H), lambda i: (0, 0)),       # b2
        pl.BlockSpec((H, H), lambda i: (0, 0)),       # w3
        pl.BlockSpec((1, H), lambda i: (0, 0)),       # b3
        pl.BlockSpec((H, H), lambda i: (0, 0)),       # w4
        pl.BlockSpec((1, H), lambda i: (0, 0)),       # b4
        pl.BlockSpec((H, OUT), lambda i: (0, 0)),     # w5
        pl.BlockSpec((1, OUT), lambda i: (0, 0)),     # b5
    ]
    out_specs = pl.BlockSpec((TB, OUT), lambda i: (i, 0))

    flops = 2 * B * (D_IN * H + 3 * H * H + H * OUT)
    bytes_accessed = (
        B * D_IN * 4                                   # f32 x stream
        + B * OUT * 4                                  # f32 logits
        + (D_IN * H + 3 * H * H + H * OUT) * 2         # bf16 weights
        + (4 * H + OUT) * 4                            # f32 biases
    )

    return pl.pallas_call(
        _mlp_kernel,
        out_shape=jax.ShapeDtypeStruct((B, OUT), jnp.float32),
        grid=(n_tiles,),
        in_specs=in_specs,
        out_specs=out_specs,
        compiler_params=pltpu.CompilerParams(
            dimension_semantics=("parallel",)),
        cost_estimate=pl.CostEstimate(
            flops=flops, transcendentals=0, bytes_accessed=bytes_accessed),
    )(*operands)


def init_params(key):
    """Deterministic synthetic init matching the nn.Linear shapes.

    PyTorch stores Linear weights as (out, in); here they are kept as (in, out)
    so the kernel computes x @ W directly (identical to x @ W_pt.T). Biases are
    (1, out) rows for clean broadcasting.
    """
    dims = [(D_IN, H), (H, H), (H, H), (H, H), (H, OUT)]
    params = {}
    keys = jax.random.split(key, 2 * len(dims))
    for i, (fan_in, fan_out) in enumerate(dims):
        bound = 1.0 / jnp.sqrt(jnp.float32(fan_in))
        params[f"w{i + 1}"] = jax.random.uniform(
            keys[2 * i], (fan_in, fan_out), dtype=jnp.float32,
            minval=-bound, maxval=bound)
        params[f"b{i + 1}"] = jax.random.uniform(
            keys[2 * i + 1], (1, fan_out), dtype=jnp.float32,
            minval=-bound, maxval=bound)
    return params


def reference_forward_f32(x, params):
    """Pure-f32 JAX reference (matches the PyTorch module semantics)."""
    h = x.reshape(x.shape[0], D_IN)
    for i in range(1, 5):
        h = jnp.maximum(h @ params[f"w{i}"] + params[f"b{i}"], 0.0)
    return h @ params["w5"] + params["b5"]


def reference_forward_bf16(x, params):
    """Reference mirroring the kernel's bf16-operand / f32-accumulate path."""
    h = x.reshape(x.shape[0], D_IN)
    for i in range(1, 6):
        wi = params[f"w{i}"].astype(jnp.bfloat16)
        h = jnp.dot(h.astype(jnp.bfloat16), wi,
                    preferred_element_type=jnp.float32) + params[f"b{i}"]
        if i < 5:
            h = jnp.maximum(h, 0.0)
    return h


if __name__ == "__main__":
    key = jax.random.PRNGKey(0)
    k_param, k_x, k_x2 = jax.random.split(key, 3)

    params = init_params(k_param)

    # Small batch of synthetic "MNIST" images, NCHW like PyTorch.
    x = jax.random.normal(k_x, (4, 1, 28, 28), dtype=jnp.float32)
    out = jax.block_until_ready(mnist_forward(x, params))
    assert out.shape == (4, 10), out.shape
    assert jnp.allclose(out, reference_forward_bf16(x, params), atol=2e-2, rtol=2e-2), \
        "mismatch vs bf16-path reference"
    assert jnp.allclose(out, reference_forward_f32(x, params), atol=5e-2, rtol=5e-2), \
        "mismatch vs f32 reference"

    # Larger ragged batch: exercises the 2-step grid (v7x core split) and the
    # partial last block (no wrapper batch padding).
    x_big = jax.random.normal(k_x2, (300, 1, 28, 28), dtype=jnp.float32)
    out_big = jax.block_until_ready(mnist_forward(x_big, params))
    assert out_big.shape == (300, 10), out_big.shape
    assert jnp.allclose(out_big, reference_forward_bf16(x_big, params),
                        atol=2e-2, rtol=2e-2), "mismatch vs reference (large batch)"
    assert jnp.allclose(out_big, reference_forward_f32(x_big, params),
                        atol=5e-2, rtol=5e-2), "mismatch vs f32 reference (large batch)"

    print("KERNEL_OK")
</pallas_src>

<mosaic_0001>
module attributes {stable_mosaic.version = 11 : i64} {
  func.func @_mlp_kernel(%arg0: i32, %arg1: memref<8x784xf32, #tpu.memory_space<vmem>>, %arg2: memref<784x64xbf16, #tpu.memory_space<vmem>>, %arg3: memref<1x64xf32, #tpu.memory_space<vmem>>, %arg4: memref<64x64xbf16, #tpu.memory_space<vmem>>, %arg5: memref<1x64xf32, #tpu.memory_space<vmem>>, %arg6: memref<64x64xbf16, #tpu.memory_space<vmem>>, %arg7: memref<1x64xf32, #tpu.memory_space<vmem>>, %arg8: memref<64x64xbf16, #tpu.memory_space<vmem>>, %arg9: memref<1x64xf32, #tpu.memory_space<vmem>>, %arg10: memref<64x10xbf16, #tpu.memory_space<vmem>>, %arg11: memref<1x10xf32, #tpu.memory_space<vmem>>, %arg12: memref<8x10xf32, #tpu.memory_space<vmem>>) attributes {dimension_semantics = [#tpu.dimension_semantics<parallel>], iteration_bounds = array<i64: 1>, scalar_prefetch = 0 : i64, scratch_operands = 0 : i64, tpu.core_type = #tpu.core_type<tc>, window_params = [{transform_indices = @transform_0, window_bounds = array<i64: 8, 784>}, {pipeline_mode = #tpu.pipeline_mode<synchronous>, transform_indices = @transform_1, window_bounds = array<i64: 784, 64>}, {pipeline_mode = #tpu.pipeline_mode<synchronous>, transform_indices = @transform_2, window_bounds = array<i64: 1, 64>}, {pipeline_mode = #tpu.pipeline_mode<synchronous>, transform_indices = @transform_3, window_bounds = array<i64: 64, 64>}, {pipeline_mode = #tpu.pipeline_mode<synchronous>, transform_indices = @transform_4, window_bounds = array<i64: 1, 64>}, {pipeline_mode = #tpu.pipeline_mode<synchronous>, transform_indices = @transform_5, window_bounds = array<i64: 64, 64>}, {pipeline_mode = #tpu.pipeline_mode<synchronous>, transform_indices = @transform_6, window_bounds = array<i64: 1, 64>}, {pipeline_mode = #tpu.pipeline_mode<synchronous>, transform_indices = @transform_7, window_bounds = array<i64: 64, 64>}, {pipeline_mode = #tpu.pipeline_mode<synchronous>, transform_indices = @transform_8, window_bounds = array<i64: 1, 64>}, {pipeline_mode = #tpu.pipeline_mode<synchronous>, transform_indices = @transform_9, window_bounds = array<i64: 64, 10>}, {pipeline_mode = #tpu.pipeline_mode<synchronous>, transform_indices = @transform_10, window_bounds = array<i64: 1, 10>}, {transform_indices = @transform_11, window_bounds = array<i64: 8, 10>}]} {
    %c0 = arith.constant 0 : index
    %c0_0 = arith.constant 0 : index
    %0 = vector.load %arg1[%c0, %c0_0] : memref<8x784xf32, #tpu.memory_space<vmem>>, vector<8x784xf32>
    %1 = arith.truncf %0 : vector<8x784xf32> to vector<8x784xbf16>
    %c0_1 = arith.constant 0 : index
    %c0_2 = arith.constant 0 : index
    %2 = vector.load %arg2[%c0_1, %c0_2] : memref<784x64xbf16, #tpu.memory_space<vmem>>, vector<784x64xbf16>
    %cst = arith.constant dense<0.000000e+00> : vector<8x64xf32>
    %3 = tpu.matmul %1, %2, %cst {dimension_numbers = #tpu.dot_dimension_numbers<[1], [0], [0], [1], [0, 0, 1, 1], [], []>} : vector<8x784xbf16>, vector<784x64xbf16>, vector<8x64xf32> -> vector<8x64xf32>
    %c0_3 = arith.constant 0 : index
    %c0_4 = arith.constant 0 : index
    %4 = vector.load %arg3[%c0_3, %c0_4] : memref<1x64xf32, #tpu.memory_space<vmem>>, vector<1x64xf32>
    %5 = vector.broadcast %4 : vector<1x64xf32> to vector<8x64xf32>
    %6 = arith.addf %3, %5 : vector<8x64xf32>
    %cst_5 = arith.constant 0.000000e+00 : f32
    %7 = vector.broadcast %cst_5 : f32 to vector<8x64xf32>
    %8 = arith.maximumf %6, %7 : vector<8x64xf32>
    %9 = arith.truncf %8 : vector<8x64xf32> to vector<8x64xbf16>
    %c0_6 = arith.constant 0 : index
    %c0_7 = arith.constant 0 : index
    %10 = vector.load %arg4[%c0_6, %c0_7] : memref<64x64xbf16, #tpu.memory_space<vmem>>, vector<64x64xbf16>
    %cst_8 = arith.constant dense<0.000000e+00> : vector<8x64xf32>
    %11 = tpu.matmul %9, %10, %cst_8 {dimension_numbers = #tpu.dot_dimension_numbers<[1], [0], [0], [1], [0, 0, 1, 1], [], []>} : vector<8x64xbf16>, vector<64x64xbf16>, vector<8x64xf32> -> vector<8x64xf32>
    %c0_9 = arith.constant 0 : index
    %c0_10 = arith.constant 0 : index
    %12 = vector.load %arg5[%c0_9, %c0_10] : memref<1x64xf32, #tpu.memory_space<vmem>>, vector<1x64xf32>
    %13 = vector.broadcast %12 : vector<1x64xf32> to vector<8x64xf32>
    %14 = arith.addf %11, %13 : vector<8x64xf32>
    %cst_11 = arith.constant 0.000000e+00 : f32
    %15 = vector.broadcast %cst_11 : f32 to vector<8x64xf32>
    %16 = arith.maximumf %14, %15 : vector<8x64xf32>
    %17 = arith.truncf %16 : vector<8x64xf32> to vector<8x64xbf16>
    %c0_12 = arith.constant 0 : index
    %c0_13 = arith.constant 0 : index
    %18 = vector.load %arg6[%c0_12, %c0_13] : memref<64x64xbf16, #tpu.memory_space<vmem>>, vector<64x64xbf16>
    %cst_14 = arith.constant dense<0.000000e+00> : vector<8x64xf32>
    %19 = tpu.matmul %17, %18, %cst_14 {dimension_numbers = #tpu.dot_dimension_numbers<[1], [0], [0], [1], [0, 0, 1, 1], [], []>} : vector<8x64xbf16>, vector<64x64xbf16>, vector<8x64xf32> -> vector<8x64xf32>
    %c0_15 = arith.constant 0 : index
    %c0_16 = arith.constant 0 : index
    %20 = vector.load %arg7[%c0_15, %c0_16] : memref<1x64xf32, #tpu.memory_space<vmem>>, vector<1x64xf32>
    %21 = vector.broadcast %20 : vector<1x64xf32> to vector<8x64xf32>
    %22 = arith.addf %19, %21 : vector<8x64xf32>
    %cst_17 = arith.constant 0.000000e+00 : f32
    %23 = vector.broadcast %cst_17 : f32 to vector<8x64xf32>
    %24 = arith.maximumf %22, %23 : vector<8x64xf32>
    %25 = arith.truncf %24 : vector<8x64xf32> to vector<8x64xbf16>
    %c0_18 = arith.constant 0 : index
    %c0_19 = arith.constant 0 : index
    %26 = vector.load %arg8[%c0_18, %c0_19] : memref<64x64xbf16, #tpu.memory_space<vmem>>, vector<64x64xbf16>
    %cst_20 = arith.constant dense<0.000000e+00> : vector<8x64xf32>
    %27 = tpu.matmul %25, %26, %cst_20 {dimension_numbers = #tpu.dot_dimension_numbers<[1], [0], [0], [1], [0, 0, 1, 1], [], []>} : vector<8x64xbf16>, vector<64x64xbf16>, vector<8x64xf32> -> vector<8x64xf32>
    %c0_21 = arith.constant 0 : index
    %c0_22 = arith.constant 0 : index
    %28 = vector.load %arg9[%c0_21, %c0_22] : memref<1x64xf32, #tpu.memory_space<vmem>>, vector<1x64xf32>
    %29 = vector.broadcast %28 : vector<1x64xf32> to vector<8x64xf32>
    %30 = arith.addf %27, %29 : vector<8x64xf32>
    %cst_23 = arith.constant 0.000000e+00 : f32
    %31 = vector.broadcast %cst_23 : f32 to vector<8x64xf32>
    %32 = arith.maximumf %30, %31 : vector<8x64xf32>
    %33 = arith.truncf %32 : vector<8x64xf32> to vector<8x64xbf16>
    %c0_24 = arith.constant 0 : index
    %c0_25 = arith.constant 0 : index
    %34 = vector.load %arg10[%c0_24, %c0_25] : memref<64x10xbf16, #tpu.memory_space<vmem>>, vector<64x10xbf16>
    %cst_26 = arith.constant dense<0.000000e+00> : vector<8x10xf32>
    %35 = tpu.matmul %33, %34, %cst_26 {dimension_numbers = #tpu.dot_dimension_numbers<[1], [0], [0], [1], [0, 0, 1, 1], [], []>} : vector<8x64xbf16>, vector<64x10xbf16>, vector<8x10xf32> -> vector<8x10xf32>
    %c0_27 = arith.constant 0 : index
    %c0_28 = arith.constant 0 : index
    %36 = vector.load %arg11[%c0_27, %c0_28] : memref<1x10xf32, #tpu.memory_space<vmem>>, vector<1x10xf32>
    %37 = vector.broadcast %36 : vector<1x10xf32> to vector<8x10xf32>
    %38 = arith.addf %35, %37 : vector<8x10xf32>
    %c0_29 = arith.constant 0 : index
    %c0_30 = arith.constant 0 : index
    %39 = vector.load %arg12[%c0_29, %c0_30] : memref<8x10xf32, #tpu.memory_space<vmem>>, vector<8x10xf32>
    tpu.vector_store %arg12[%c0_29, %c0_30], %38 {strides = array<i32>} : memref<8x10xf32, #tpu.memory_space<vmem>>, vector<8x10xf32>,
    return
  }
  func.func @transform_0(%arg0: i32) -> (i32, i32) {
    %c0_i32 = arith.constant 0 : i32
    %c0_i32_0 = arith.constant 0 : i32
    return %arg0, %c0_i32 : i32, i32
  }
  func.func @transform_1(%arg0: i32) -> (i32, i32) {
    %c0_i32 = arith.constant 0 : i32
    %c0_i32_0 = arith.constant 0 : i32
    %c0_i32_1 = arith.constant 0 : i32
    return %c0_i32, %c0_i32_0 : i32, i32
  }
  func.func @transform_2(%arg0: i32) -> (i32, i32) {
    %c0_i32 = arith.constant 0 : i32
    %c0_i32_0 = arith.constant 0 : i32
    %c0_i32_1 = arith.constant 0 : i32
    return %c0_i32, %c0_i32_0 : i32, i32
  }
  func.func @transform_3(%arg0: i32) -> (i32, i32) {
    %c0_i32 = arith.constant 0 : i32
    %c0_i32_0 = arith.constant 0 : i32
    %c0_i32_1 = arith.constant 0 : i32
    return %c0_i32, %c0_i32_0 : i32, i32
  }
  func.func @transform_4(%arg0: i32) -> (i32, i32) {
    %c0_i32 = arith.constant 0 : i32
    %c0_i32_0 = arith.constant 0 : i32
    %c0_i32_1 = arith.constant 0 : i32
    return %c0_i32, %c0_i32_0 : i32, i32
  }
  func.func @transform_5(%arg0: i32) -> (i32, i32) {
    %c0_i32 = arith.constant 0 : i32
    %c0_i32_0 = arith.constant 0 : i32
    %c0_i32_1 = arith.constant 0 : i32
    return %c0_i32, %c0_i32_0 : i32, i32
  }
  func.func @transform_6(%arg0: i32) -> (i32, i32) {
    %c0_i32 = arith.constant 0 : i32
    %c0_i32_0 = arith.constant 0 : i32
    %c0_i32_1 = arith.constant 0 : i32
    return %c0_i32, %c0_i32_0 : i32, i32
  }
  func.func @transform_7(%arg0: i32) -> (i32, i32) {
    %c0_i32 = arith.constant 0 : i32
    %c0_i32_0 = arith.constant 0 : i32
    %c0_i32_1 = arith.constant 0 : i32
    return %c0_i32, %c0_i32_0 : i32, i32
  }
  func.func @transform_8(%arg0: i32) -> (i32, i32) {
    %c0_i32 = arith.constant 0 : i32
    %c0_i32_0 = arith.constant 0 : i32
    %c0_i32_1 = arith.constant 0 : i32
    return %c0_i32, %c0_i32_0 : i32, i32
  }
  func.func @transform_9(%arg0: i32) -> (i32, i32) {
    %c0_i32 = arith.constant 0 : i32
    %c0_i32_0 = arith.constant 0 : i32
    %c0_i32_1 = arith.constant 0 : i32
    return %c0_i32, %c0_i32_0 : i32, i32
  }
  func.func @transform_10(%arg0: i32) -> (i32, i32) {
    %c0_i32 = arith.constant 0 : i32
    %c0_i32_0 = arith.constant 0 : i32
    %c0_i32_1 = arith.constant 0 : i32
    return %c0_i32, %c0_i32_0 : i32, i32
  }
  func.func @transform_11(%arg0: i32) -> (i32, i32) {
    %c0_i32 = arith.constant 0 : i32
    %c0_i32_0 = arith.constant 0 : i32
    return %arg0, %c0_i32 : i32, i32
  }
}

</mosaic_0001>

<bundles_post_ra>
// kernel: mnist_forward.1
= control target key start
LH: loop header
LB: loop body
LE: loop exit
PB: predicated region body
PF: predicated region fallthrough
CT: control target
= control target key end

     0   :  { %16 = vsyncpa [#allocation3], 0  ;;  %v1316_v43 = vmov 0.0   ;;  %vm1317_vm0 = vmmov 0   ;;  %vm476_vm1 = vcmask 130048   ;;  %vm681_vm2 = vcmask 523264   ;;  %s1655_s0 = inlined_call_operand.vmem [shape: f32[4,784], index: 0, kind: input, shape index: {}]   ;;  %s1656_s1 = inlined_call_operand.vmem [shape: bf16[784,64], index: 1, kind: input, shape index: {}]   ;;  %s1657_s2 = inlined_call_operand.vmem [shape: f32[1,64], index: 2, kind: input, shape index: {}]   ;;  %s1658_s3 = inlined_call_operand.vmem [shape: bf16[64,64], index: 3, kind: input, shape index: {}]   ;;  %s1659_s4 = inlined_call_operand.vmem [shape: f32[1,64], index: 4, kind: input, shape index: {}]   ;;  %s1660_s5 = inlined_call_operand.vmem [shape: bf16[64,64], index: 5, kind: input, shape index: {}]   ;;  %s1661_s6 = inlined_call_operand.vmem [shape: f32[1,64], index: 6, kind: input, shape index: {}]   ;;  %s1662_s7 = inlined_call_operand.vmem [shape: bf16[64,64], index: 7, kind: input, shape index: {}]   ;;  %s1663_s8 = inlined_call_operand.vmem [shape: f32[1,64], index: 8, kind: input, shape index: {}]   ;;  %s1664_s9 = inlined_call_operand.vmem [shape: bf16[64,10], index: 9, kind: input, shape index: {}]   ;;  %s1665_s10 = inlined_call_operand.vmem [shape: f32[1,10], index: 10, kind: input, shape index: {}]   ;;  %s1666_s11 = inlined_call_operand.hbm [shape: f32[4,10], index: 11, kind: output, shape index: {}]  }
   0x1   :  { %v1217_v0 = vld [vmem:[%s1656_s1 + $0x40] sm:$0xff]   ;;  %v1221_v4 = vld [vmem:[%s1656_s1 + $0x48] sm:$0xff]   ;;  %v1225_v8 = vld [vmem:[%s1656_s1 + $0x50] sm:$0xff]   ;;  %vm977_vm3 = vcmask 80896  }
   0x2   :  { %v1218_v1 = vld [vmem:[%s1656_s1] sm:$0xff]   ;;  %1070 = vmatprep.subr.bf16.mxu0 %v1217_v0  ;;  %v1222_v5 = vld [vmem:[%s1656_s1 + $0x8] sm:$0xff]   ;;  %v1226_v9 = vld [vmem:[%s1656_s1 + $0x10] sm:$0xff]  }
   0x3   :  { %v1219_v2 = vld [vmem:[%s1656_s1 + $0xc0] sm:$0xff]   ;;  %1071 = vmatpush3.bf16.msra.mxu0 %v1218_v1  ;;  %v1223_v6 = vld [vmem:[%s1656_s1 + $0xc8] sm:$0xff]   ;;  %v1227_v10 = vld [vmem:[%s1656_s1 + $0xd0] sm:$0xff]  }
   0x4   :  { %v1220_v3 = vld [vmem:[%s1656_s1 + $0x80] sm:$0xff]   ;;  %1092 = vmatprep.subr.bf16.mxu1 %v1219_v2  ;;  %1072 = vmatprep.subr.bf16.mxu0 %v1221_v4  ;;  %v1224_v7 = vld [vmem:[%s1656_s1 + $0x88] sm:$0xff]   ;;  %v1228_v11 = vld [vmem:[%s1656_s1 + $0x90] sm:$0xff]  }
   0x5   :  { %1093 = vmatpush3.bf16.msra.mxu1 %v1220_v3  ;;  %v1229_v12 = vld [vmem:[%s1656_s1 + $0x58] sm:$0xff]   ;;  %v1233_v16 = vld [vmem:[%s1656_s1 + $0x60] sm:$0xff]   ;;  %v1237_v20 = vld [vmem:[%s1656_s1 + $0x68] sm:$0xff]  }
   0x6   :  { %1094 = vmatprep.subr.bf16.mxu1 %v1223_v6  ;;  %v1230_v13 = vld [vmem:[%s1656_s1 + $0x18] sm:$0xff]   ;;  %v1234_v17 = vld [vmem:[%s1656_s1 + $0x20] sm:$0xff]   ;;  %v1238_v21 = vld [vmem:[%s1656_s1 + $0x28] sm:$0xff]  }
   0x7   :  { %1073 = vmatpush3.bf16.msra.mxu0 %v1222_v5  ;;  %v1231_v14 = vld [vmem:[%s1656_s1 + $0xd8] sm:$0xff]   ;;  %v1235_v18 = vld [vmem:[%s1656_s1 + $0xe0] sm:$0xff]   ;;  %v1239_v22 = vld [vmem:[%s1656_s1 + $0xe8] sm:$0xff]  }
   0x8   :  { %1074 = vmatprep.subr.bf16.mxu0 %v1225_v8  ;;  %v1232_v15 = vld [vmem:[%s1656_s1 + $0x98] sm:$0xff]   ;;  %v1236_v19 = vld [vmem:[%s1656_s1 + $0xa0] sm:$0xff]   ;;  %v1240_v23 = vld [vmem:[%s1656_s1 + $0xa8] sm:$0xff]  }
   0x9   :  { %1095 = vmatpush3.bf16.msra.mxu1 %v1224_v7  ;;  %v1241_v24 = vld [vmem:[%s1656_s1 + $0x70] sm:$0xff]   ;;  %v1245_v28 = vld [vmem:[%s1656_s1 + $0x78] sm:$0xff]   ;;  %v1250_v32 = vld [vmem:[%s1655_s0 + $0x4] ss:$28 sps:$4 sm:$0xff]  }
   0xa   :  { %1096 = vmatprep.subr.bf16.mxu1 %v1227_v10  ;;  %v1242_v25 = vld [vmem:[%s1656_s1 + $0x30] sm:$0xff]   ;;  %v1246_v29 = vld [vmem:[%s1656_s1 + $0x38] sm:$0xff]   ;;  %v71_v35 = vpack.c.bf16 %v1250_v32, %v1250_v32  ;;  %v1252_v36 = vld [vmem:[%s1656_s1 + $0x140] sm:$0xff]  }
   0xb   :  { %1075 = vmatpush3.bf16.msra.mxu0 %v1226_v9  ;;  %v1243_v26 = vld [vmem:[%s1656_s1 + $0xf0] sm:$0xff]   ;;  %v1247_v30 = vld [vmem:[%s1656_s1 + $0xf8] sm:$0xff]   ;;  %v1253_v37 = vld [vmem:[%s1655_s0 + $0x8] ss:$28 sps:$4 sm:$0xff]  }
   0xc   :  { %1076 = vmatprep.subr.bf16.mxu0 %v1229_v12  ;;  %v1244_v27 = vld [vmem:[%s1656_s1 + $0xb0] sm:$0xff]   ;;  %v1248_v31 = vld [vmem:[%s1655_s0] ss:$28 sps:$4 sm:$0xff]   ;;  %v1255_v38 = vld [vmem:[%s1655_s0 + $0xc] ss:$28 sps:$4 sm:$0xff]   ;;  %512 = vmatprep.mubr.bf16.mxu0 %v71_v35  ;;  %v72_v40 = vpack.c.bf16 %v1253_v37, %v1253_v37 }
   0xd   :  { %1097 = vmatpush3.bf16.msra.mxu1 %v1228_v11  ;;  %v1251_v33 = vld [vmem:[%s1656_s1 + $0xb8] sm:$0xff]   ;;  %v70_v34 = vpack.c.bf16 %v1248_v31, %v1248_v31  ;;  %v1256_v39 = vld [vmem:[%s1656_s1 + $0x100] sm:$0xff]   ;;  %v73_v41 = vpack.c.bf16 %v1255_v38, %v1255_v38  ;;  %v1257_v42 = vld [vmem:[%s1656_s1 + $0x148] sm:$0xff]  }
   0xe   :  { %1098 = vmatprep.subr.bf16.mxu1 %v1231_v14  ;;  %v1258_v44 = vld [vmem:[%s1656_s1 + $0x108] sm:$0xff]   ;;  %v1259_v45 = vld [vmem:[%s1656_s1 + $0x150] sm:$0xff]   ;;  %v1261_v47 = vld [vmem:[%s1656_s1 + $0x158] sm:$0xff]  }
   0xf   :  { %1077 = vmatpush3.bf16.msra.mxu0 %v1230_v13  ;;  %552 = vmatprep.mubr.bf16.mxu1 %v73_v41  ;;  %v1260_v46 = vld [vmem:[%s1656_s1 + $0x110] sm:$0xff]   ;;  %v1262_v48 = vld [vmem:[%s1656_s1 + $0x118] sm:$0xff]   ;;  %v1263_v49 = vld [vmem:[%s1656_s1 + $0x160] sm:$0xff]  }
  0x10   :  { %1078 = vmatprep.subr.bf16.mxu0 %v1233_v16  ;;  %v1264_v50 = vld [vmem:[%s1656_s1 + $0x120] sm:$0xff]   ;;  %v1265_v51 = vld [vmem:[%s1656_s1 + $0x168] sm:$0xff]   ;;  %v1267_v54 = vld [vmem:[%s1656_s1 + $0x170] sm:$0xff]  }
  0x11   :  { %1099 = vmatpush3.bf16.msra.mxu1 %v1232_v15  ;;  %v1271_v52 = vld [vmem:[%s1656_s1 + $0x180] sm:$0xff]   ;;  %v1266_v53 = vld [vmem:[%s1656_s1 + $0x128] sm:$0xff]   ;;  %v1274_v55 = vld [vmem:[%s1655_s0 + $0x14] ss:$28 sps:$4 sm:$0xff]  }
  0x12   :  { %1100 = vmatprep.subr.bf16.mxu1 %v1235_v18  ;;  %v1275_v56 = vld [vmem:[%s1655_s0 + $0x18] ss:$28 sps:$4 sm:$0xff]   ;;  %v75_v57 = vpack.c.bf16 %v1274_v55, %v1274_v55  ;;  %v1272_v61 = vld [vmem:[%s1655_s0 + $0x10] ss:$28 sps:$4 sm:$0xff]   ;;  %v1276_v0 = vld [vmem:[%s1658_s3] sm:$0xff]  }
  0x13   :  { %1079 = vmatpush3.bf16.msra.mxu0 %v1234_v17  ;;  %v1268_v58 = vld [vmem:[%s1656_s1 + $0x130] sm:$0xff]   ;;  %v76_v59 = vpack.c.bf16 %v1275_v56, %v1275_v56  ;;  %v1269_v60 = vld [vmem:[%s1656_s1 + $0x178] sm:$0xff]   ;;  %v74_v63 = vpack.c.bf16 %v1272_v61, %v1272_v61  ;;  %v1277_v1 = vld [vmem:[%s1658_s3 + $0x8] sm:$0xff]  }
  0x14   :  { %1080 = vmatprep.subr.bf16.mxu0 %v1237_v20  ;;  %v1270_v62 = vld [vmem:[%s1656_s1 + $0x138] sm:$0xff]   ;;  %v1278_v2 = vld [vmem:[%s1658_s3 + $0x10] sm:$0xff]   ;;  %v995_v5 = vld [vmem:[%s1657_s2] ss:$0 sm:$0xff] }
  0x15   :  { %1101 = vmatpush3.bf16.msra.mxu1 %v1236_v19  ;;  %v1279_v3 = vld [vmem:[%s1658_s3 + $0x18] sm:$0xff]   ;;  %v1281_v31 = vld [vmem:[%s1660_s5 + $0x8] sm:$0xff]   ;;  %v1282_v32 = vld [vmem:[%s1660_s5 + $0x10] sm:$0xff]  }
  0x16   :  { %1102 = vmatprep.subr.bf16.mxu1 %v1239_v22  ;;  %v1285_v35 = vld [vmem:[%s1662_s7 + $0x8] sm:$0xff]  }
  0x17   :  { %1081 = vmatpush3.bf16.msra.mxu0 %v1238_v21 }
  0x18   :  { %1082 = vmatprep.subr.bf16.mxu0 %v1241_v24 }
  0x19   :  { %1103 = vmatpush3.bf16.msra.mxu1 %v1240_v23 }
  0x1a   :  { %1104 = vmatprep.subr.bf16.mxu1 %v1243_v26 }
  0x1b   :  { %1083 = vmatpush3.bf16.msra.mxu0 %v1242_v25 }
  0x1c   :  { %1084 = vmatprep.subr.bf16.mxu0 %v1245_v28 }
  0x1d   :  { %1105 = vmatpush3.bf16.msra.mxu1 %v1244_v27 }
  0x1e   :  { %1106 = vmatprep.subr.bf16.mxu1 %v1247_v30 }
  0x1f   :  { %1085 = vmatpush3.bf16.msra.mxu0 %v1246_v29  ;;  %v1280_v29 = vld [vmem:[%s1660_s5] sm:$0xff]  }
  0x20   :  { %1114 = vmatprep.subr.bf16.mxu0 %v1252_v36  ;;  %v1046_v36 = vld [vmem:[%s1659_s4] ss:$0 sm:$0xff] }
  0x21   :  { %1107 = vmatpush3.bf16.msra.mxu1 %v1251_v33  ;;  %v1283_v33 = vld [vmem:[%s1660_s5 + $0x18] sm:$0xff]  }
  0x22   :  { %513 = vmatmul.mubr.bf16.vlgmr.msra.gmra.mrb[0].mxu0 %v70_v34  ;;  %1158 = vmatprep.subr.bf16.mxu1 %v1316_v43  ;;  %v1284_v34 = vld [vmem:[%s1662_s7] sm:$0xff]  }
  0x23   :  { %1115 = vmatpush3.bf16.msra.mxu0 %v1256_v39  ;;  %592 = vmatprep.mubr.bf16.mxu0 %v75_v57  ;;  %v1290_v57 = vld [vmem:[%s1664_s9 + $0x10] sm:$0xff]  }
  0x24   :  { %1116 = vmatprep.subr.bf16.mxu0 %v1257_v42  ;;  %553 = vmatmul.mubr.bf16.vlgmr.msra.gmra.mrb[0].mxu1 %v72_v40 }
  0x25   :  { %1160 = vmatprep.mubr.msk.bf16.mxu1 %vm1317_vm0, %v1316_v43  ;;  %1159 = vmatpush3.bf16.msra.mxu1 %v1271_v52 }
  0x26   :  { %1164 = vmatprep.subr.bf16.mxu1 %v1316_v43 }
  0x27   :  { %1117 = vmatpush3.bf16.msra.mxu0 %v1258_v44 }
  0x28   :  { %1118 = vmatprep.subr.bf16.mxu0 %v1259_v45  ;;  %v1286_v45 = vld [vmem:[%s1662_s7 + $0x10] sm:$0xff]  }
  0x2b   :  { %1119 = vmatpush3.bf16.msra.mxu0 %v1260_v46  ;;  %v1287_v46 = vld [vmem:[%s1662_s7 + $0x18] sm:$0xff]  }
  0x2c   :  { %1120 = vmatprep.subr.bf16.mxu0 %v1261_v47  ;;  %1161 = vmatmul.mubr.msk.bf16.vlgmr.msra.gmra.mrb[4].mxu1 %vm476_vm1, %v76_v59  ;;  %v1288_v47 = vld [vmem:[%s1664_s9] sm:$0xff]  }
  0x2d   :  { %1172 = vmatprep.mubr.msk.bf16.mxu1 %vm1317_vm0, %v1316_v43  ;;  %1165 = vmatpush3.bf16.msra.mxu1 %v1276_v0  ;;  %v1058_v59 = vld [vmem:[%s1663_s8] ss:$0 sm:$0xff] }
  0x2e   :  { %1166 = vmatprep.subr.bf16.mxu1 %v1316_v43 }
  0x2f   :  { %1121 = vmatpush3.bf16.msra.mxu0 %v1262_v48  ;;  %v1289_v48 = vld [vmem:[%s1664_s9 + $0x8] sm:$0xff]  }
  0x30   :  { %1122 = vmatprep.subr.bf16.mxu0 %v1263_v49  ;;  %v1052_v49 = vld [vmem:[%s1661_s6] ss:$0 sm:$0xff] }
  0x31   :  { %1167 = vmatpush3.bf16.msra.mxu1 %v1277_v1 }
  0x32   :  { %1168 = vmatprep.subr.bf16.mxu1 %v1316_v43 }
  0x33   :  { %1123 = vmatpush3.bf16.msra.mxu0 %v1264_v50 }
  0x34   :  { %1124 = vmatprep.subr.bf16.mxu0 %v1265_v51 }
  0x35   :  { %1169 = vmatpush3.bf16.msra.mxu1 %v1278_v2 }
  0x36   :  { %1170 = vmatprep.subr.bf16.mxu1 %v1316_v43 }
  0x37   :  { %1125 = vmatpush3.bf16.msra.mxu0 %v1266_v53 }
  0x38   :  { %1126 = vmatprep.subr.bf16.mxu0 %v1267_v54 }
  0x39   :  { %1171 = vmatpush3.bf16.msra.mxu1 %v1279_v3 }
  0x3a   :  { %1176 = vmatprep.subr.bf16.mxu1 %v1316_v43 }
  0x3b   :  { %1127 = vmatpush3.bf16.msra.mxu0 %v1268_v58  ;;  %v1291_v58 = vld [vmem:[%s1664_s9 + $0x18] sm:$0xff]  }
  0x3c   :  { %1128 = vmatprep.subr.bf16.mxu0 %v1269_v60 }
  0x3f   :  { %1129 = vmatpush3.bf16.msra.mxu0 %v1270_v62 }
  0x40   :  { %1188 = vmatprep.subr.bf16.mxu0 %v1316_v43 }
  0x42   :  { %593 = vmatmul.mubr.bf16.vlgmr.msra.gmra.mrb[4].mxu0 %v74_v63 }
  0x43   :  { %1196 = vmatprep.mubr.msk.bf16.mxu0 %vm1317_vm0, %v1316_v43  ;;  %1189 = vmatpush3.bf16.msra.mxu0 %v1284_v34 }
  0x44   :  { %1190 = vmatprep.subr.bf16.mxu0 %v1316_v43 }
  0x47   :  { %1191 = vmatpush3.bf16.msra.mxu0 %v1285_v35 }
  0x48   :  { %1192 = vmatprep.subr.bf16.mxu0 %v1316_v43 }
  0x4b   :  { %1193 = vmatpush3.bf16.msra.mxu0 %v1286_v45 }
  0x4c   :  { %1194 = vmatprep.subr.bf16.mxu0 %v1316_v43 }
  0x4f   :  { %1195 = vmatpush3.bf16.msra.mxu0 %v1287_v46 }
  0xf5   :  { %v1086_v4 = vpop.f32.mrb[0].mxu0 }
  0xf6   :  { %v1087_v6 = vpop.f32.mrb[1].mxu0 }
  0xf7   :  { %v1088_v7 = vadd.f32 %v1087_v6, %v1086_v4  ;;  %v1089_v8 = vpop.f32.mrb[2].mxu0  ;;  %v1108_v9 = vpop.f32.mrb[0].mxu1 }
  0xf8   :  { %v1090_v10 = vpop.f32.mrb[3].mxu0  ;;  %v1109_v12 = vpop.f32.mrb[1].mxu1 }
  0xf9   :  { %v515_v11 = vadd.f32 %v1088_v7, %v995_v5  ;;  %v1110_v13 = vadd.f32 %v1109_v12, %v1108_v9  ;;  %v1111_v14 = vpop.f32.mrb[2].mxu1 }
  0xfa   :  { %v1112_v15 = vpop.f32.mrb[3].mxu1 }
  0xfb   :  { %v555_v16 = vadd.f32 %v1110_v13, %v515_v11 }
  0xff   :  { %v634_v17 = vpop.f32.mrb[4].mxu1 }
 0x100   :  { %v1162_v18 = vpop.f32.mrb[5].mxu1 }
 0x101   :  { %v637_v19 = vpop.f32.mrb[6].mxu1 }
 0x102   :  { %v1163_v20 = vpop.f32.mrb[7].mxu1 }
 0x115   :  { %v1130_v21 = vpop.f32.mrb[4].mxu0 }
 0x116   :  { %v1131_v22 = vpop.f32.mrb[5].mxu0 }
 0x117   :  { %v1132_v23 = vadd.f32 %v1131_v22, %v1130_v21  ;;  %v1133_v24 = vpop.f32.mrb[6].mxu0 }
 0x118   :  { %v1134_v25 = vpop.f32.mrb[7].mxu0 }
 0x119   :  { %v595_v26 = vadd.f32 %v1132_v23, %v555_v16 }
 0x11b   :  { %v635_v27 = vadd.f32 %v634_v17, %v595_v26 }
 0x11d   :  { %v640_v28 = vmax.f32 %v635_v27, 0.0 }
 0x11f   :  { %v641_v30 = vpack.c.bf16 %v640_v28, %v640_v28 }
 0x121   :  { %1173 = vmatmul.mubr.msk.bf16.vlgmr.msra.gmra.mrb[8].mxu1 %vm681_vm2, %v641_v30 }
 0x122   :  { %1177 = vmatpush3.bf16.msra.mxu1 %v1280_v29  ;;  %1184 = vmatprep.mubr.msk.bf16.mxu1 %vm1317_vm0, %v1316_v43 }
 0x123   :  { %1178 = vmatprep.subr.bf16.mxu1 %v1316_v43 }
 0x126   :  { %1179 = vmatpush3.bf16.msra.mxu1 %v1281_v31 }
 0x127   :  { %1180 = vmatprep.subr.bf16.mxu1 %v1316_v43 }
 0x12a   :  { %1181 = vmatpush3.bf16.msra.mxu1 %v1282_v32 }
 0x12b   :  { %1182 = vmatprep.subr.bf16.mxu1 %v1316_v43 }
 0x12e   :  { %1183 = vmatpush3.bf16.msra.mxu1 %v1283_v33 }
 0x12f   :  { %1200 = vmatprep.subr.bf16.mxu1 %v1316_v43 }
 0x1f4   :  { %v719_v37 = vpop.f32.mrb[8].mxu1 }
 0x1f5   :  { %v720_v38 = vadd.f32 %v1046_v36, %v719_v37  ;;  %v1174_v39 = vpop.f32.mrb[9].mxu1 }
 0x1f6   :  { %v722_v40 = vpop.f32.mrb[10].mxu1 }
 0x1f7   :  { %v725_v41 = vmax.f32 %v720_v38, 0.0  ;;  %v1175_v42 = vpop.f32.mrb[11].mxu1 }
 0x1f9   :  { %v726_v44 = vpack.c.bf16 %v725_v41, %v725_v41 }
 0x1fb   :  { %1185 = vmatmul.mubr.msk.bf16.vlgmr.msra.gmra.mrb[12].mxu1 %vm681_vm2, %v726_v44 }
 0x1fc   :  { %1208 = vmatprep.mubr.msk.bf16.mxu1 %vm1317_vm0, %v1316_v43  ;;  %1201 = vmatpush3.bf16.msra.mxu1 %v1288_v47 }
 0x1fd   :  { %1202 = vmatprep.subr.bf16.mxu1 %v1316_v43 }
 0x200   :  { %1203 = vmatpush3.bf16.msra.mxu1 %v1289_v48 }
 0x201   :  { %1204 = vmatprep.subr.bf16.mxu1 %v1316_v43 }
 0x204   :  { %1205 = vmatpush3.bf16.msra.mxu1 %v1290_v57 }
 0x205   :  { %1206 = vmatprep.subr.bf16.mxu1 %v1316_v43  ;;  %v1064_v43 = vld [vmem:[%s1665_s10] ss:$0 sm:$0xff] }
 0x208   :  { %1207 = vmatpush3.bf16.msra.mxu1 %v1291_v58 }
 0x2ce   :  { %v803_v50 = vpop.f32.mrb[12].mxu1 }
 0x2cf   :  { %v804_v51 = vadd.f32 %v1052_v49, %v803_v50  ;;  %v1186_v52 = vpop.f32.mrb[13].mxu1 }
 0x2d0   :  { %v806_v53 = vpop.f32.mrb[14].mxu1 }
 0x2d1   :  { %v809_v54 = vmax.f32 %v804_v51, 0.0  ;;  %v1187_v55 = vpop.f32.mrb[15].mxu1 }
 0x2d3   :  { %v810_v56 = vpack.c.bf16 %v809_v54, %v809_v54 }
 0x2d5   :  { %1197 = vmatmul.mubr.msk.bf16.vlgmr.msra.gmra.mrb[8].mxu0 %vm681_vm2, %v810_v56 }
 0x3a8   :  { %v887_v60 = vpop.f32.mrb[8].mxu0 }
 0x3a9   :  { %v888_v61 = vadd.f32 %v1058_v59, %v887_v60  ;;  %v1198_v62 = vpop.f32.mrb[9].mxu0 }
 0x3aa   :  { %v890_v63 = vpop.f32.mrb[10].mxu0 }
 0x3ab   :  { %v893_v0 = vmax.f32 %v888_v61, 0.0  ;;  %v1199_v1 = vpop.f32.mrb[11].mxu0 }
 0x3ad   :  { %v894_v2 = vpack.c.bf16 %v893_v0, %v893_v0 }
 0x3af   :  { %1209 = vmatmul.mubr.msk.bf16.vlgmr.msra.gmra.mrb[16].mxu1 %vm681_vm2, %v894_v2 }
 0x482   :  { %v971_v3 = vpop.f32.mrb[16].mxu1 }
 0x483   :  { %v972_v4 = vadd.f32 %v1064_v43, %v971_v3  ;;  %v1210_v5 = vpop.f32.mrb[17].mxu1 }
 0x484   :  { %v974_v6 = vpop.f32.mrb[18].mxu1 }
 0x485   :  { %978 = vst.msk [vmem:[#allocation2] sm:$0xff] %vm977_vm3, %v972_v4  ;;  %v1211_v7 = vpop.f32.mrb[19].mxu1 }
 0x486   :  { %983 = vsyncadd [#allocation3], 64  ;;  %s1318_s8 = smov [#allocation2]  }
 0x487   :  { %s984_s9 = sshll.u32 %s1318_s8, 4  ;;  %s985_s9 = int_to_ptr.vmem [resolvable:$true] %s984_s9 }
 0x488   :  { %s1292_s26 = scalar_lea.vmem %s985_s9, 64  ;;  %s1296_s27 = scalar_lea.vmem %s985_s9, 128 }
 0x489   :  { %p1293_p0 = scmp.ne.s32.totalorder %s985_s9, %s1292_s26  ;;  %p1297_p1 = scmp.lt.s32.totalorder %s985_s9, %s985_s9 }
 0x48a   :  { %p1298_p2 = scmp.lt.s32.totalorder %s1296_s27, %s1292_s26 }
 0x48c   :  { %p1299_p3 = por %p1298_p2, %p1297_p1 }
 0x48e   :  { %p1300_p4 = pnand %p1299_p3, %p1293_p0 }
 0x490   :  { %1303 = shalt.err (!%p1300_p4)
}
 0x491   :  { %s1304_s29 = scalar_lea.hbm %s1666_s11, 64 }
 0x492   :  { %p1305_p5 = scmp.ne.s32.totalorder %s1666_s11, %s1304_s29  ;;  %p1308_p6 = scmp.lt.u32.totalorder %s1304_s29, %s1666_s11 }
 0x494   :  { %p1310_p7 = pnand %p1308_p6, %p1305_p5 }
 0x496   :  { %1313 = shalt.err (!%p1310_p7)
}
 0x497   :  { %s1319_s15 = smov 64   ;;  %s1320_s5 = smov 4  }
 0x498   :  { %990 = dma.vmem_to_hbm [thread:$0]  %s985_s9, 64, %s1666_s11, [#allocation3], %s1319_s15, %s1319_s15, %s1320_s5  }
 0x499   :  { %1314 = dma.done.wait [#allocation3], 128  }
 0x49a   :  { %1315 = vsyncadd [#allocation3], 4294967168 }
 0x49b   :  { %994 = vsyncpa [#allocation3], 1 }

</bundles_post_ra>
